<compile_context>
chip_gen: v6e
topology: v6e:2x2x1
jax: 0.10.0
libtpu: 0.0.40
codegen_flags: <defaults>
</compile_context>

<pallas_src>
import jax
import jax.numpy as jnp
from jax.experimental import pallas as pl
from jax.experimental.pallas import tpu as pltpu


def _round_up(x: int, m: int) -> int:
    return ((x + m - 1) // m) * m


# Lane-dense M/N tile preferences (256-multiples first for v6e/v7x MXU) and
# K tile preferences.
_MN_PREFS = (512, 384, 256, 128)
_K_PREFS = (1024, 768, 512, 384, 256, 128)
_VMEM_BUDGET = 40 * 1024 * 1024  # stay well inside v7x's 64 MiB physical VMEM


def _choose_tile(dim: int, prefs, max_single_block: int):
    """Pick (tile, padded_dim) for one matmul dimension.

    Preference order:
      1. Largest preferred tile that divides `dim` exactly (no padding).
      2. The whole dimension as one full-extent block (exempt from the (8,128)
         divisibility rule) when it is small enough -> still no padding.
      3. Minimal zero-padding up to a multiple of a preferred tile
         (ties broken toward the larger tile).
    """
    for t in prefs:
        if dim % t == 0:
            return t, dim
    if dim <= max_single_block:
        return dim, dim
    best = min(prefs, key=lambda t: (_round_up(dim, t) - dim, -t))
    return best, _round_up(dim, best)


def _matmul_kernel_acc(x1_ref, x2_ref, o_ref, acc_ref):
    """K-split path: accumulate partial products in an f32 VMEM scratch."""
    @pl.when(pl.program_id(2) == 0)
    def _init():
        acc_ref[...] = jnp.zeros_like(acc_ref)

    acc_ref[...] += jnp.dot(
        x1_ref[...], x2_ref[...], preferred_element_type=jnp.float32
    )

    @pl.when(pl.program_id(2) == pl.num_programs(2) - 1)
    def _finalize():
        o_ref[...] = acc_ref[...].astype(o_ref.dtype)


def _matmul_kernel_single_k(x1_ref, x2_ref, o_ref):
    """Whole K in one grid step: write the MXU result directly to the output
    tile (no scratch round-trip)."""
    o_ref[...] = jnp.dot(
        x1_ref[...], x2_ref[...], preferred_element_type=jnp.float32
    ).astype(o_ref.dtype)


def addmm_cat(mat1: jax.Array, mat2: jax.Array) -> jax.Array:
    """alpha=1 addmm (no `input` term) followed by cat([v1], dim=1) (identity)."""
    M, K = mat1.shape
    K2, N = mat2.shape
    assert K == K2, "inner dimensions must match"
    out_dtype = jnp.result_type(mat1.dtype, mat2.dtype)
    in_itemsize = jnp.dtype(mat1.dtype).itemsize
    out_itemsize = jnp.dtype(out_dtype).itemsize

    # --- adaptive tile selection (prefers zero padding, large tiles) ---------
    tm, Mp = _choose_tile(M, _MN_PREFS, 512)
    tn, Np = _choose_tile(N, _MN_PREFS, 512)
    tk, Kp = _choose_tile(K, _K_PREFS, 2048)

    # If the grid fully collapsed to one block and the M tile is still big
    # enough to split into two well-fed MXU tiles, split it so both v7x
    # TensorCores get work.
    if Mp == tm and Np == tn and Kp == tk and tm % 2 == 0 and tm // 2 >= 256:
        tm //= 2

    grid = (Mp // tm, Np // tn, Kp // tk)
    single_k = grid[2] == 1

    # Double-buffered VMEM footprint: 2x A tile + 2x B tile + 2x out tile
    # (+ f32 accumulator when K is split).
    footprint = (
        2 * (tm * tk + tk * tn) * in_itemsize
        + 2 * tm * tn * out_itemsize
        + (0 if single_k else tm * tn * 4)
    )
    assert footprint <= _VMEM_BUDGET, f"tile footprint too large: {footprint}"
    vmem_limit = min(48 * 1024 * 1024, max(32 * 1024 * 1024, int(footprint * 3 // 2)))

    # Pad only when strictly required (each jnp.pad is an extra HBM round-trip).
    a = mat1 if (Mp == M and Kp == K) else jnp.pad(mat1, ((0, Mp - M), (0, Kp - K)))
    b = mat2 if (Kp == K and Np == N) else jnp.pad(mat2, ((0, Kp - K), (0, Np - N)))

    kernel = _matmul_kernel_single_k if single_k else _matmul_kernel_acc
    scratch = [] if single_k else [pltpu.VMEM((tm, tn), jnp.float32)]

    out = pl.pallas_call(
        kernel,
        out_shape=jax.ShapeDtypeStruct((Mp, Np), out_dtype),
        grid_spec=pltpu.PrefetchScalarGridSpec(
            num_scalar_prefetch=0,
            grid=grid,
            in_specs=[
                pl.BlockSpec(
                    (tm, tk),
                    lambda i, j, k: (i, k),
                    memory_space=pltpu.MemorySpace.VMEM,
                ),
                pl.BlockSpec(
                    (tk, tn),
                    lambda i, j, k: (k, j),
                    memory_space=pltpu.MemorySpace.VMEM,
                ),
            ],
            out_specs=pl.BlockSpec(
                (tm, tn),
                lambda i, j, k: (i, j),
                memory_space=pltpu.MemorySpace.VMEM,
            ),
            scratch_shapes=scratch,
        ),
        compiler_params=pltpu.CompilerParams(
            dimension_semantics=("parallel", "parallel", "arbitrary"),
            vmem_limit_bytes=vmem_limit,
        ),
        cost_estimate=pl.CostEstimate(
            flops=2 * M * K * N,
            transcendentals=0,
            bytes_accessed=(M * K + K * N) * in_itemsize + M * N * out_itemsize,
        ),
    )(a, b)

    # Strip padding only if any was introduced.
    v1 = out if (Mp == M and Np == N) else out[:M, :N]
    # torch.cat([v1], dim=1) with a single operand is the identity; return v1
    # directly so no extra copy of the output is made.
    return v1


def make_unused_conv_params():
    """Deterministic params for the (unused) Conv2d(3, 8, kernel=1, padding=1)."""
    kw = jax.random.PRNGKey(42)
    k_w, k_b = jax.random.split(kw)
    weight = jax.random.normal(k_w, (8, 3, 1, 1), dtype=jnp.float32) * 0.1
    bias = jax.random.normal(k_b, (8,), dtype=jnp.float32) * 0.1
    return weight, bias


if __name__ == "__main__":
    key = jax.random.PRNGKey(0)
    k1, k2, k3, k4 = jax.random.split(key, 4)

    # Parameters of the unused conv (kept for module parity only).
    _conv_w, _conv_b = make_unused_conv_params()

    # --- Small case (2-D operands, as the addmm call requires) --------------
    # Collapses to grid=(1,1,1), full-extent blocks, zero padding,
    # scratch-free single-K kernel.
    M, K, N = 8, 32, 16
    x1 = jax.random.normal(k1, (M, K), dtype=jnp.float32)
    x2 = jax.random.normal(k2, (K, N), dtype=jnp.float32)

    out_small = jax.block_until_ready(addmm_cat(x1, x2))
    ref_small = x1 @ x2
    assert out_small.shape == (M, N)
    assert jnp.allclose(out_small, ref_small, atol=1e-5, rtol=1e-5)

    # --- Medium case exercising the K-split accumulator path ----------------
    # tm=128, tn=256, tk=1024 -> grid=(1,1,2), f32 VMEM accumulator.
    Ml, Kl, Nl = 128, 2048, 256
    y1 = jax.random.normal(k3, (Ml, Kl), dtype=jnp.float32)
    y2 = jax.random.normal(k4, (Kl, Nl), dtype=jnp.float32)

    out_med = jax.block_until_ready(addmm_cat(y1, y2))
    ref_med = y1 @ y2
    assert out_med.shape == (Ml, Nl)
    assert jnp.allclose(out_med, ref_med, atol=2e-2, rtol=2e-3)

    print("KERNEL_OK")
</pallas_src>

<mosaic_0001>
module attributes {stable_mosaic.version = 11 : i64} {
  func.func @_matmul_kernel_single_k(%arg0: i32, %arg1: i32, %arg2: i32, %arg3: memref<8x32xf32, #tpu.memory_space<vmem>>, %arg4: memref<32x16xf32, #tpu.memory_space<vmem>>, %arg5: memref<8x16xf32, #tpu.memory_space<vmem>>) attributes {dimension_semantics = [#tpu.dimension_semantics<parallel>, #tpu.dimension_semantics<parallel>, #tpu.dimension_semantics<arbitrary>], iteration_bounds = array<i64: 1, 1, 1>, scalar_prefetch = 0 : i64, scratch_operands = 0 : i64, tpu.core_type = #tpu.core_type<tc>, window_params = [{transform_indices = @transform_0, window_bounds = array<i64: 8, 32>}, {transform_indices = @transform_1, window_bounds = array<i64: 32, 16>}, {transform_indices = @transform_2, window_bounds = array<i64: 8, 16>}]} {
    %c0 = arith.constant 0 : index
    %c0_0 = arith.constant 0 : index
    %0 = vector.load %arg3[%c0, %c0_0] : memref<8x32xf32, #tpu.memory_space<vmem>>, vector<8x32xf32>
    %c0_1 = arith.constant 0 : index
    %c0_2 = arith.constant 0 : index
    %1 = vector.load %arg4[%c0_1, %c0_2] : memref<32x16xf32, #tpu.memory_space<vmem>>, vector<32x16xf32>
    %cst = arith.constant dense<0.000000e+00> : vector<8x16xf32>
    %2 = tpu.matmul %0, %1, %cst {dimension_numbers = #tpu.dot_dimension_numbers<[1], [0], [0], [1], [0, 0, 1, 1], [], []>} : vector<8x32xf32>, vector<32x16xf32>, vector<8x16xf32> -> vector<8x16xf32>
    %c0_3 = arith.constant 0 : index
    %c0_4 = arith.constant 0 : index
    %3 = vector.load %arg5[%c0_3, %c0_4] : memref<8x16xf32, #tpu.memory_space<vmem>>, vector<8x16xf32>
    tpu.vector_store %arg5[%c0_3, %c0_4], %2 {strides = array<i32>} : memref<8x16xf32, #tpu.memory_space<vmem>>, vector<8x16xf32>,
    return
  }
  func.func @transform_0(%arg0: i32, %arg1: i32, %arg2: i32) -> (i32, i32) {
    %c0_i32 = arith.constant 0 : i32
    return %arg0, %arg2 : i32, i32
  }
  func.func @transform_1(%arg0: i32, %arg1: i32, %arg2: i32) -> (i32, i32) {
    %c0_i32 = arith.constant 0 : i32
    return %arg2, %arg1 : i32, i32
  }
  func.func @transform_2(%arg0: i32, %arg1: i32, %arg2: i32) -> (i32, i32) {
    %c0_i32 = arith.constant 0 : i32
    return %arg0, %arg1 : i32, i32
  }
}

</mosaic_0001>

<bundles_post_ra>
// kernel: tpu_custom_call.1
= control target key start
LH: loop header
LB: loop body
LE: loop exit
PB: predicated region body
PF: predicated region fallthrough
CT: control target
= control target key end

     0   :  { %v149_v1 = vmov 0.0   ;;  %vm150_vm0 = vmmov 0   ;;  %s185_s0 = inlined_call_operand.vmem [shape: f32[8,32], index: 0, kind: input, shape index: {}]   ;;  %s186_s1 = inlined_call_operand.vmem [shape: f32[32,16], index: 1, kind: input, shape index: {}]   ;;  %s187_s2 = inlined_call_operand.hbm [shape: f32[8,16], index: 2, kind: output, shape index: {}]  }
   0x1   :  { %v16_v0 = vld [vmem:[%s186_s1 + $0x18] sm:$0xff]  ;;  %113 = vmatprep.subr.mxu0 %v149_v1  ;;  %v15_v2 = vld [vmem:[%s186_s1 + $0x10] sm:$0xff]  ;;  %121 = vmatprep.mubr.msk.f32.mxu0 %vm150_vm0, %v149_v1 }
   0x2   :  { %7 = vsyncpa [#allocation3], 0  ;;  %114 = vmatpush3.msra.mxu0 %v16_v0  ;;  %v14_v3 = vld [vmem:[%s186_s1 + $0x8] sm:$0xff]  ;;  %v13_v4 = vld [vmem:[%s186_s1] sm:$0xff]  ;;  %vm17_vm1 = vcmask 261120   ;;  %s151_s19 = smov [#allocation2]  }
   0x3   :  { %115 = vmatprep.subr.mxu0 %v149_v1  ;;  %v12_v5 = vld [vmem:[%s185_s0] sm:$0xff]  ;;  %s99_s20 = sshll.u32 %s151_s19, 4  ;;  %vm91_vm2 = vcmask 130048   ;;  %s100_s20 = int_to_ptr.vmem [resolvable:$true] %s99_s20 }
   0x4   :  { %116 = vmatpush3.msra.mxu0 %v15_v2  ;;  %s127_s21 = scalar_lea.vmem %s100_s20, 128  ;;  %p132_p1 = scmp.lt.s32.totalorder %s100_s20, %s100_s20 }
   0x5   :  { %117 = vmatprep.subr.mxu0 %v149_v1  ;;  %p128_p0 = scmp.ne.s32.totalorder %s100_s20, %s127_s21  ;;  %p133_p2 = scmp.lt.s32.totalorder %s127_s21, %s127_s21 }
   0x6   :  { %118 = vmatpush3.msra.mxu0 %v14_v3 }
   0x7   :  { %119 = vmatprep.subr.mxu0 %v149_v1  ;;  %p134_p3 = por %p133_p2, %p132_p1 }
   0x8   :  { %120 = vmatpush3.msra.mxu0 %v13_v4 }
   0x9   :  { %122 = vmatmul.mubr.msk.f32.vlgmr.msra.gmra.mxu0 %vm17_vm1, %v12_v5  ;;  %p135_p4 = pnand %p134_p3, %p128_p0 }
  0xc9   :  { %v87_v6 = vpop.f32.mrf.mxu0 }
  0xca   :  { %92 = vst.msk [vmem:[#allocation2] sm:$0xff] %vm91_vm2, %v87_v6 }
  0xcb   :  { %v123_v7 = vpop.f32.mrf.mxu0 }
  0xcc   :  { %138 = shalt.err (!%p135_p4)
}
  0xcd   :  { %102 = dma.vmem_to_hbm [thread:$0]  %s100_s20, 128, %s187_s2, [#allocation3]  }
  0xce   :  { %147 = dma.done.wait [#allocation3], 128  }
  0xcf   :  { %148 = vsyncadd [#allocation3], 4294967168 }
  0xd0   :  { %106 = vsyncpa [#allocation3], 1 }

</bundles_post_ra>
